<compile_context>
chip_gen: v6e
topology: v6e:2x2x1
jax: 0.10.0
libtpu: 0.0.40
codegen_flags: <defaults>
</compile_context>

<pallas_src>
import jax
import jax.numpy as jnp
from jax.experimental import pallas as pl
from jax.experimental.pallas import tpu as pltpu


def _round_up(n, m):
    return ((n + m - 1) // m) * m


# --------------------------------------------------------------------------
# Kernel
# --------------------------------------------------------------------------
def _logreg_kernel(x_ref, wt_ref, b_ref, o_ref, acc_ref):
    # x_ref: (TB, TK), wt_ref: (TK, TN), b_ref: (1, TN), o_ref/acc_ref: (TB, TN)
    k = pl.program_id(2)

    @pl.when(k == 0)
    def _():
        acc_ref[...] = jnp.zeros_like(acc_ref)

    acc_ref[...] += jnp.dot(
        x_ref[...], wt_ref[...], preferred_element_type=jnp.float32
    )

    @pl.when(k == pl.num_programs(2) - 1)
    def _():
        z = acc_ref[...] + b_ref[...]
        # sigmoid(z) = 0.5 * tanh(z/2) + 0.5 — single EUP transcendental per
        # element, exact to f32 roundoff (well within 1e-5).
        o_ref[...] = (0.5 * jnp.tanh(0.5 * z) + 0.5).astype(o_ref.dtype)


# --------------------------------------------------------------------------
# Tiling policy
# --------------------------------------------------------------------------
_TB_CAP = 512   # batch rows per tile (amortizes ~0.35 us/grid-step overhead)
_TN_CAP = 512   # class columns per tile (multiple of 128 -> lane-dense stores)
_TK_CAP = 512   # contraction slice per tile (MXU/pipeline friendly)


def _pick_batch_tile(B):
    """Largest multiple of 8 <= cap dividing B (no pad), else pad to mult of 8."""
    if B % 8 == 0:
        tb = 8
        for t in range(8, min(_TB_CAP, B) + 1, 8):
            if B % t == 0:
                tb = t
        return tb, B
    tb = min(_TB_CAP, _round_up(B, 8))
    return tb, _round_up(B, tb)


def _make_block_spec(shape, index_map, *, single_buffered=False):
    if single_buffered:
        try:
            return pl.BlockSpec(shape, index_map, pipeline_mode=pl.Buffered(1))
        except TypeError:  # older jax without pipeline_mode kwarg
            pass
    return pl.BlockSpec(shape, index_map)


# --------------------------------------------------------------------------
# One-time parameter layout (do NOT redo per forward)
# --------------------------------------------------------------------------
def prepare_logreg_params(weight, bias):
    """weight: [C, D] (PyTorch nn.Linear), bias: [C].

    Returns (w_t_padded [Dp, Cp], bias_2d [1, Cp], C).
    Zero padding of extra rows/columns does not change the matmul result.
    """
    C, D = weight.shape
    TN = min(_TN_CAP, _round_up(max(C, 1), 128))
    Cp = _round_up(max(C, 1), TN)
    Dp = D if D <= _TK_CAP else _round_up(D, _TK_CAP)

    w_t = weight.T                                      # [D, C]
    w_t = jnp.pad(w_t, ((0, Dp - D), (0, Cp - C)))
    bias_2d = jnp.pad(bias, (0, Cp - C)).reshape(1, Cp)
    return w_t, bias_2d, C


# --------------------------------------------------------------------------
# Forward
# --------------------------------------------------------------------------
def logistic_regression_forward(x, w_t, bias_2d, num_classes):
    """sigmoid(x @ W^T + b); w_t / bias_2d come from prepare_logreg_params()."""
    B, D = x.shape
    Dp, Cp = w_t.shape
    assert bias_2d.shape == (1, Cp)
    assert Dp >= D

    TB, Bp = _pick_batch_tile(B)
    TN = min(_TN_CAP, Cp)
    TK = Dp if Dp <= _TK_CAP else _TK_CAP

    x_p = x
    if Bp != B or Dp != D:
        x_p = jnp.pad(x, ((0, Bp - B), (0, Dp - D)))

    grid = (Bp // TB, Cp // TN, Dp // TK)
    nt, kt = grid[1], grid[2]
    w_single = (nt == 1 and kt == 1)   # weight block invariant across the grid
    b_single = (nt == 1)               # bias block invariant across the grid

    # VMEM budget: double-buffered x/out tiles + (single- or double-buffered)
    # weight/bias tiles + accumulator, with 2x headroom; floor 32 MiB, cap
    # 48 MiB so a v7x TC (64 MiB) keeps headroom.
    tile_bytes = (
        2 * (TB * TK + TB * TN) * 4
        + (1 if w_single else 2) * TK * TN * 4
        + (1 if b_single else 2) * TN * 4
        + TB * TN * 4
    )
    vmem_limit = int(min(48 * 1024 * 1024, max(32 * 1024 * 1024, 2 * tile_bytes)))

    cost = pl.CostEstimate(
        flops=2 * Bp * Dp * Cp,
        transcendentals=Bp * Cp,
        bytes_accessed=4 * (Bp * Dp + Dp * Cp + Bp * Cp),
    )

    out_padded = pl.pallas_call(
        _logreg_kernel,
        out_shape=jax.ShapeDtypeStruct((Bp, Cp), jnp.float32),
        grid_spec=pltpu.PrefetchScalarGridSpec(
            num_scalar_prefetch=0,
            grid=grid,
            in_specs=[
                pl.BlockSpec((TB, TK), lambda i, j, k: (i, k)),        # x
                _make_block_spec((TK, TN), lambda i, j, k: (k, j),
                                 single_buffered=w_single),            # W^T
                _make_block_spec((1, TN), lambda i, j, k: (0, j),
                                 single_buffered=b_single),            # bias
            ],
            out_specs=pl.BlockSpec((TB, TN), lambda i, j, k: (i, j)),
            scratch_shapes=[pltpu.VMEM((TB, TN), jnp.float32)],
        ),
        compiler_params=pltpu.CompilerParams(
            dimension_semantics=("parallel", "parallel", "arbitrary"),
            vmem_limit_bytes=vmem_limit,
        ),
        cost_estimate=cost,
    )(x_p, w_t, bias_2d)

    return out_padded[:B, :num_classes]


def reference_forward(x, weight, bias):
    return jax.nn.sigmoid(x @ weight.T + bias)


if __name__ == "__main__":
    key = jax.random.PRNGKey(0)
    k_x, k_w, k_b = jax.random.split(key, 3)

    batch = 8
    input_dim = 32   # number of features
    output_dim = 4   # number of classes

    x = jax.random.normal(k_x, (batch, input_dim), dtype=jnp.float32)
    # Deterministic init mimicking nn.Linear uniform(-1/sqrt(D), 1/sqrt(D))
    bound = 1.0 / (input_dim ** 0.5)
    weight = jax.random.uniform(
        k_w, (output_dim, input_dim), dtype=jnp.float32, minval=-bound, maxval=bound
    )
    bias = jax.random.uniform(
        k_b, (output_dim,), dtype=jnp.float32, minval=-bound, maxval=bound
    )

    # One-time layout plumbing (transpose + pad), reused across forwards.
    w_t, bias_2d, n_classes = prepare_logreg_params(weight, bias)

    out = logistic_regression_forward(x, w_t, bias_2d, n_classes)
    out = jax.block_until_ready(out)

    ref = reference_forward(x, weight, bias)
    assert out.shape == (batch, output_dim)
    assert jnp.allclose(out, ref, atol=1e-5, rtol=1e-5)

    print("KERNEL_OK")
</pallas_src>

<mosaic_0001>
module attributes {stable_mosaic.version = 11 : i64} {
  func.func @_logreg_kernel(%arg0: i32, %arg1: i32, %arg2: i32, %arg3: memref<8x32xf32, #tpu.memory_space<vmem>>, %arg4: memref<32x128xf32, #tpu.memory_space<vmem>>, %arg5: memref<1x128xf32, #tpu.memory_space<vmem>>, %arg6: memref<8x128xf32, #tpu.memory_space<vmem>>, %arg7: memref<8x128xf32, #tpu.memory_space<vmem>>) attributes {dimension_semantics = [#tpu.dimension_semantics<parallel>, #tpu.dimension_semantics<parallel>, #tpu.dimension_semantics<arbitrary>], iteration_bounds = array<i64: 1, 1, 1>, scalar_prefetch = 0 : i64, scratch_operands = 1 : i64, tpu.core_type = #tpu.core_type<tc>, window_params = [{transform_indices = @transform_0, window_bounds = array<i64: 8, 32>}, {pipeline_mode = #tpu.pipeline_mode<synchronous>, transform_indices = @transform_1, window_bounds = array<i64: 32, 128>}, {pipeline_mode = #tpu.pipeline_mode<synchronous>, transform_indices = @transform_2, window_bounds = array<i64: 1, 128>}, {transform_indices = @transform_3, window_bounds = array<i64: 8, 128>}]} {
    %c0_i32 = arith.constant 0 : i32
    %0 = arith.cmpi eq, %arg2, %c0_i32 : i32
    %1 = arith.extui %0 : i1 to i32
    %c0_i32_0 = arith.constant 0 : i32
    %2 = arith.cmpi ne, %1, %c0_i32_0 : i32
    scf.if %2 {
      %cst_10 = arith.constant 0.000000e+00 : f32
      %12 = vector.broadcast %cst_10 : f32 to vector<8x128xf32>
      %c0_11 = arith.constant 0 : index
      %c0_12 = arith.constant 0 : index
      %13 = vector.load %arg7[%c0_11, %c0_12] : memref<8x128xf32, #tpu.memory_space<vmem>>, vector<8x128xf32>
      tpu.vector_store %arg7[%c0_11, %c0_12], %12 {strides = array<i32>} : memref<8x128xf32, #tpu.memory_space<vmem>>, vector<8x128xf32>,
    } else {
    }
    %c0 = arith.constant 0 : index
    %c0_1 = arith.constant 0 : index
    %3 = vector.load %arg7[%c0, %c0_1] : memref<8x128xf32, #tpu.memory_space<vmem>>, vector<8x128xf32>
    %c0_2 = arith.constant 0 : index
    %c0_3 = arith.constant 0 : index
    %4 = vector.load %arg3[%c0_2, %c0_3] : memref<8x32xf32, #tpu.memory_space<vmem>>, vector<8x32xf32>
    %c0_4 = arith.constant 0 : index
    %c0_5 = arith.constant 0 : index
    %5 = vector.load %arg4[%c0_4, %c0_5] : memref<32x128xf32, #tpu.memory_space<vmem>>, vector<32x128xf32>
    %cst = arith.constant dense<0.000000e+00> : vector<8x128xf32>
    %6 = tpu.matmul %4, %5, %cst {dimension_numbers = #tpu.dot_dimension_numbers<[1], [0], [0], [1], [0, 0, 1, 1], [], []>} : vector<8x32xf32>, vector<32x128xf32>, vector<8x128xf32> -> vector<8x128xf32>
    %7 = arith.addf %3, %6 : vector<8x128xf32>
    %c0_6 = arith.constant 0 : index
    %c0_7 = arith.constant 0 : index
    %8 = vector.load %arg7[%c0_6, %c0_7] : memref<8x128xf32, #tpu.memory_space<vmem>>, vector<8x128xf32>
    tpu.vector_store %arg7[%c0_6, %c0_7], %7 {strides = array<i32>} : memref<8x128xf32, #tpu.memory_space<vmem>>, vector<8x128xf32>,
    %c0_i32_8 = arith.constant 0 : i32
    %9 = arith.cmpi eq, %arg2, %c0_i32_8 : i32
    %10 = arith.extui %9 : i1 to i32
    %c0_i32_9 = arith.constant 0 : i32
    %11 = arith.cmpi ne, %10, %c0_i32_9 : i32
    scf.if %11 {
      %c0_10 = arith.constant 0 : index
      %c0_11 = arith.constant 0 : index
      %12 = vector.load %arg7[%c0_10, %c0_11] : memref<8x128xf32, #tpu.memory_space<vmem>>, vector<8x128xf32>
      %c0_12 = arith.constant 0 : index
      %c0_13 = arith.constant 0 : index
      %13 = vector.load %arg5[%c0_12, %c0_13] : memref<1x128xf32, #tpu.memory_space<vmem>>, vector<1x128xf32>
      %14 = vector.broadcast %13 : vector<1x128xf32> to vector<8x128xf32>
      %15 = arith.addf %12, %14 : vector<8x128xf32>
      %cst_14 = arith.constant 5.000000e-01 : f32
      %16 = vector.broadcast %cst_14 : f32 to vector<8x128xf32>
      %17 = arith.mulf %16, %15 : vector<8x128xf32>
      %18 = math.tanh %17 : vector<8x128xf32>
      %cst_15 = arith.constant 5.000000e-01 : f32
      %19 = vector.broadcast %cst_15 : f32 to vector<8x128xf32>
      %20 = arith.mulf %19, %18 : vector<8x128xf32>
      %cst_16 = arith.constant 5.000000e-01 : f32
      %21 = vector.broadcast %cst_16 : f32 to vector<8x128xf32>
      %22 = arith.addf %20, %21 : vector<8x128xf32>
      %c0_17 = arith.constant 0 : index
      %c0_18 = arith.constant 0 : index
      %23 = vector.load %arg6[%c0_17, %c0_18] : memref<8x128xf32, #tpu.memory_space<vmem>>, vector<8x128xf32>
      tpu.vector_store %arg6[%c0_17, %c0_18], %22 {strides = array<i32>} : memref<8x128xf32, #tpu.memory_space<vmem>>, vector<8x128xf32>,
    } else {
    }
    return
  }
  func.func @transform_0(%arg0: i32, %arg1: i32, %arg2: i32) -> (i32, i32) {
    %c0_i32 = arith.constant 0 : i32
    return %arg0, %arg2 : i32, i32
  }
  func.func @transform_1(%arg0: i32, %arg1: i32, %arg2: i32) -> (i32, i32) {
    %c0_i32 = arith.constant 0 : i32
    return %arg2, %arg1 : i32, i32
  }
  func.func @transform_2(%arg0: i32, %arg1: i32, %arg2: i32) -> (i32, i32) {
    %c0_i32 = arith.constant 0 : i32
    %c0_i32_0 = arith.constant 0 : i32
    return %c0_i32, %arg1 : i32, i32
  }
  func.func @transform_3(%arg0: i32, %arg1: i32, %arg2: i32) -> (i32, i32) {
    %c0_i32 = arith.constant 0 : i32
    return %arg0, %arg1 : i32, i32
  }
}

</mosaic_0001>

<bundles_post_ra>
// kernel: tpu_custom_call.1
= control target key start
LH: loop header
LB: loop body
LE: loop exit
PB: predicated region body
PF: predicated region fallthrough
CT: control target
= control target key end

     0   :  { %8 = vsyncpa [#allocation4], 0  ;;  %s293_s0 = inlined_call_operand.hbm [shape: f32[8,32], index: 0, kind: input, shape index: {}]   ;;  %s294_s1 = inlined_call_operand.hbm [shape: f32[32,128], index: 1, kind: input, shape index: {}]   ;;  %s295_s2 = inlined_call_operand.vmem [shape: f32[1,128], index: 2, kind: input, shape index: {}]   ;;  %s296_s3 = inlined_call_operand.hbm [shape: f32[8,128], index: 3, kind: output, shape index: {}]  }
   0x1   :  { %9 = vsyncpa [#allocation7], 0 }
   0x2   :  { %10 = vsyncpa [#allocation5], 0  ;;  %s254_s12 = smov [#allocation3]   ;;  %s255_s14 = smov [#allocation6]  }
   0x3   :  { %s17_s13 = sshll.u32 %s254_s12, 4  ;;  %s26_s15 = sshll.u32 %s255_s14, 4  ;;  %s18_s13 = int_to_ptr.vmem [resolvable:$true] %s17_s13  ;;  %s27_s15 = int_to_ptr.vmem [resolvable:$true] %s26_s15 }
   0x4   :  { %s196_s16 = scalar_lea.vmem %s18_s13, 128  ;;  %p201_p1 = scmp.lt.s32.totalorder %s18_s13, %s18_s13 }
   0x5   :  { %p197_p0 = scmp.ne.s32.totalorder %s18_s13, %s196_s16  ;;  %p202_p2 = scmp.lt.s32.totalorder %s196_s16, %s196_s16 }
   0x7   :  { %p203_p3 = por %p202_p2, %p201_p1 }
   0x9   :  { %p204_p4 = pnand %p203_p3, %p197_p0 }
   0xb   :  { %207 = shalt.err (!%p204_p4)
}
   0xc   :  { %20 = dma.hbm_to_vmem [thread:$0]  %s293_s0, 128, %s18_s13, [#allocation4]  }
   0xd   :  { %s216_s19 = scalar_lea.vmem %s27_s15, 512  ;;  %p221_p6 = scmp.lt.s32.totalorder %s27_s15, %s27_s15 }
   0xe   :  { %p217_p5 = scmp.ne.s32.totalorder %s27_s15, %s216_s19  ;;  %p222_p7 = scmp.lt.s32.totalorder %s216_s19, %s216_s19 }
  0x10   :  { %p223_p8 = por %p222_p7, %p221_p6 }
  0x12   :  { %p224_p9 = pnand %p223_p8, %p217_p5 }
  0x14   :  { %227 = shalt.err (!%p224_p9)
}
  0x15   :  { %s256_s20 = smov 128   ;;  %s257_s21 = smov 8  }
  0x16   :  { %32 = dma.hbm_to_vmem [thread:$0]  %s294_s1, 512, %s27_s15, [#allocation7], %s256_s20, %s256_s20, %s257_s21  }
  0x17   :  { %248 = dma.done.wait [#allocation4], 128  }
  0x18   :  { %249 = vsyncadd [#allocation4], 4294967168 }
  0x19   :  { %250 = dma.done.wait [#allocation7], 512  }
  0x1a   :  { %251 = vsyncadd [#allocation7], 4294966784  ;;  %v258_v0 = vmov 0.0   ;;  %vm259_vm0 = vmmov 0   ;;  %v51_v1 = vld [vmem:[#allocation6 + $0x18] sm:$0xff]  ;;  %v50_v2 = vld [vmem:[#allocation6 + $0x10] sm:$0xff] }
  0x1b   :  { %168 = vmatprep.subr.mxu0 %v258_v0  ;;  %176 = vmatprep.mubr.msk.f32.mxu0 %vm259_vm0, %v258_v0  ;;  %v49_v3 = vld [vmem:[#allocation6 + $0x8] sm:$0xff]  ;;  %v48_v4 = vld [vmem:[#allocation6] sm:$0xff]  ;;  %v47_v5 = vld [vmem:[#allocation3] sm:$0xff]  ;;  %vm52_vm1 = vcmask 261120   ;;  %s260_s24 = smov [#allocation8]  }
  0x1c   :  { %169 = vmatpush3.msra.mxu0 %v51_v1  ;;  %v162_v6 = vld [vmem:[%s295_s2] ss:$0 sm:$0xff]  ;;  %s151_s25 = sshll.u32 %s260_s24, 4  ;;  %s152_s25 = int_to_ptr.vmem [resolvable:$true] %s151_s25 }
  0x1d   :  { %170 = vmatprep.subr.mxu0 %v258_v0  ;;  %s228_s26 = scalar_lea.vmem %s152_s25, 128  ;;  %p233_p11 = scmp.lt.s32.totalorder %s152_s25, %s152_s25 }
  0x1e   :  { %171 = vmatpush3.msra.mxu0 %v50_v2  ;;  %p229_p10 = scmp.ne.s32.totalorder %s152_s25, %s228_s26  ;;  %p234_p12 = scmp.lt.s32.totalorder %s228_s26, %s228_s26 }
  0x1f   :  { %172 = vmatprep.subr.mxu0 %v258_v0 }
  0x20   :  { %173 = vmatpush3.msra.mxu0 %v49_v3  ;;  %p235_p13 = por %p234_p12, %p233_p11 }
  0x21   :  { %174 = vmatprep.subr.mxu0 %v258_v0 }
  0x22   :  { %175 = vmatpush3.msra.mxu0 %v48_v4  ;;  %p236_p0 = pnand %p235_p13, %p229_p10 }
  0x23   :  { %177 = vmatmul.mubr.msk.f32.vlgmr.msra.gmra.mxu0 %vm52_vm1, %v47_v5 }
  0xe3   :  { %v122_v7 = vpop.f32.mrf.mxu0 }
  0xe4   :  { %v139_v8 = vadd.f32 %v162_v6, %v122_v7 }
  0xe5   :  { %v178_v9 = vpop.f32.mrf.mxu0 }
  0xe6   :  { %v140_v10 = vmul.f32 0.5, %v139_v8 }
  0xe8   :  { %186 = vtanh.f32 %v140_v10 }
  0xf5   :  { %v187_v11 = vpop.eup %186 }
  0xf6   :  { %v142_v12 = vmul.f32 0.5, %v187_v11 }
  0xf8   :  { %v143_v13 = vadd.f32 0.5, %v142_v12 }
  0xfa   :  { %144 = vst [vmem:[#allocation8] sm:$0xff] %v143_v13 }
  0xfb   :  { %239 = shalt.err (!%p236_p0)
}
  0xfc   :  { %154 = dma.vmem_to_hbm [thread:$0]  %s152_s25, 128, %s296_s3, [#allocation5]  }
  0xfd   :  { %252 = dma.done.wait [#allocation5], 128  }
  0xfe   :  { %253 = vsyncadd [#allocation5], 4294967168 }
  0xff   :  { %158 = vsyncpa [#allocation4], 1 }
 0x100   :  { %159 = vsyncpa [#allocation7], 1 }
 0x101   :  { %160 = vsyncpa [#allocation5], 1 }

</bundles_post_ra>
